<compile_context>
chip_gen: v7x
topology: tpu7x:2x2x1
jax: 0.10.0
libtpu: 0.0.40
codegen_flags: <defaults>
</compile_context>

<pallas_src>
import jax
import jax.numpy as jnp
from jax.experimental import pallas as pl
from jax.experimental.pallas import tpu as pltpu

LOG_STD_MIN = -20.0
LOG_STD_MAX = 2.0

_LANE = 128      # lane width (last dim)
_SUBLANE = 8     # sublane width (second-to-last dim, f32)


def _round_up(x, m):
    return pl.cdiv(x, m) * m


# ---------------------------------------------------------------------------
# Kernel
# ---------------------------------------------------------------------------
def safe_actor_kernel(x_ref, w1_ref, b1_ref, w2_ref, b2_ref, wh_ref, bh_ref,
                      mean_ref, log_std_ref):
    # fc1 + ReLU  (bf16 matmul, f32 accumulate, f32 elementwise)
    h1 = jnp.dot(x_ref[...], w1_ref[...], preferred_element_type=jnp.float32)
    h1 = jnp.maximum(h1 + b1_ref[...], 0.0).astype(w2_ref.dtype)

    # fc2 + ReLU
    h2 = jnp.dot(h1, w2_ref[...], preferred_element_type=jnp.float32)
    h2 = jnp.maximum(h2 + b2_ref[...], 0.0).astype(wh_ref.dtype)

    # Fused mean|log_std head: single MXU pass producing a lane-dense
    # [TB, 2*A_pad] tile; split at the 128-aligned boundary.
    heads = jnp.dot(h2, wh_ref[...], preferred_element_type=jnp.float32)
    heads = heads + bh_ref[...]
    a_pad = mean_ref.shape[-1]
    mean_ref[...] = heads[:, :a_pad]
    log_std_ref[...] = jnp.clip(heads[:, a_pad:], LOG_STD_MIN, LOG_STD_MAX)


# ---------------------------------------------------------------------------
# Wrapper
# ---------------------------------------------------------------------------
def safe_actor_forward(state, params, *, compute_dtype=jnp.bfloat16,
                       batch_tile=512):
    """SafeActor forward pass.

    state:  [B, state_dim] float32
    params: dict with w1[in,out], b1[1,out], w2, b2, wm, bm, ws, bs
    returns (mean[B, action_dim], log_std[B, action_dim]) in float32
    """
    B, K = state.shape
    H = params["w1"].shape[1]
    A = params["wm"].shape[1]

    K_pad = _round_up(K, _LANE)
    H_pad = _round_up(H, _LANE)
    A_pad = _round_up(A, _LANE)

    # Batch tiling: pad to sublane multiple, then (if large) to a tile multiple.
    B_pad = _round_up(B, _SUBLANE)
    if B_pad <= batch_tile:
        TB = B_pad
    else:
        TB = batch_tile
        B_pad = _round_up(B_pad, TB)

    def pad2(a, rows, cols, dtype):
        return jnp.pad(a.astype(dtype),
                       ((0, rows - a.shape[0]), (0, cols - a.shape[1])))

    x = pad2(state, B_pad, K_pad, compute_dtype)
    w1 = pad2(params["w1"], K_pad, H_pad, compute_dtype)
    b1 = pad2(params["b1"], 1, H_pad, jnp.float32)
    w2 = pad2(params["w2"], H_pad, H_pad, compute_dtype)
    b2 = pad2(params["b2"], 1, H_pad, jnp.float32)
    # Fused head weight [H_pad, 2*A_pad] = [wm_pad | ws_pad], bias likewise.
    wh = jnp.concatenate([pad2(params["wm"], H_pad, A_pad, compute_dtype),
                          pad2(params["ws"], H_pad, A_pad, compute_dtype)],
                         axis=1)
    bh = jnp.concatenate([pad2(params["bm"], 1, A_pad, jnp.float32),
                          pad2(params["bs"], 1, A_pad, jnp.float32)],
                         axis=1)

    grid = (B_pad // TB,)
    resident = lambda i: (0, 0)   # weights/biases: same block every step
    batched = lambda i: (i, 0)    # state/outputs: tiled over batch

    flops = 2 * B_pad * (K_pad * H_pad + H_pad * H_pad + H_pad * 2 * A_pad)
    bytes_accessed = (
        x.size * x.dtype.itemsize
        + sum(a.size * a.dtype.itemsize for a in (w1, b1, w2, b2, wh, bh))
        + 2 * B_pad * A_pad * 4)

    mean_p, log_std_p = pl.pallas_call(
        safe_actor_kernel,
        out_shape=(jax.ShapeDtypeStruct((B_pad, A_pad), jnp.float32),
                   jax.ShapeDtypeStruct((B_pad, A_pad), jnp.float32)),
        grid=grid,
        in_specs=[
            pl.BlockSpec((TB, K_pad), batched),          # state tile
            pl.BlockSpec((K_pad, H_pad), resident),      # w1
            pl.BlockSpec((1, H_pad), resident),          # b1
            pl.BlockSpec((H_pad, H_pad), resident),      # w2
            pl.BlockSpec((1, H_pad), resident),          # b2
            pl.BlockSpec((H_pad, 2 * A_pad), resident),  # fused head weight
            pl.BlockSpec((1, 2 * A_pad), resident),      # fused head bias
        ],
        out_specs=(pl.BlockSpec((TB, A_pad), batched),
                   pl.BlockSpec((TB, A_pad), batched)),
        compiler_params=pltpu.CompilerParams(
            dimension_semantics=("parallel",),
            vmem_limit_bytes=48 * 1024 * 1024),
        cost_estimate=pl.CostEstimate(flops=int(flops), transcendentals=0,
                                      bytes_accessed=int(bytes_accessed)),
    )(x, w1, b1, w2, b2, wh, bh)

    return mean_p[:B, :A], log_std_p[:B, :A]


# ---------------------------------------------------------------------------
# Params init (PyTorch-style Kaiming-uniform-ish), weights stored [in, out]
# ---------------------------------------------------------------------------
def init_params(key, state_dim, action_dim, hidden_dim):
    def linear(key, fan_in, fan_out):
        kw, kb = jax.random.split(key)
        bound = 1.0 / jnp.sqrt(fan_in)
        w = jax.random.uniform(kw, (fan_in, fan_out), jnp.float32, -bound, bound)
        b = jax.random.uniform(kb, (1, fan_out), jnp.float32, -bound, bound)
        return w, b

    k1, k2, k3, k4 = jax.random.split(key, 4)
    w1, b1 = linear(k1, state_dim, hidden_dim)
    w2, b2 = linear(k2, hidden_dim, hidden_dim)
    wm, bm = linear(k3, hidden_dim, action_dim)
    ws, bs = linear(k4, hidden_dim, action_dim)
    return dict(w1=w1, b1=b1, w2=w2, b2=b2, wm=wm, bm=bm, ws=ws, bs=bs)


# ---------------------------------------------------------------------------
# Pure-JAX references
# ---------------------------------------------------------------------------
def reference_forward_f32(state, p):
    h1 = jnp.maximum(state @ p["w1"] + p["b1"], 0.0)
    h2 = jnp.maximum(h1 @ p["w2"] + p["b2"], 0.0)
    mean = h2 @ p["wm"] + p["bm"]
    log_std = jnp.clip(h2 @ p["ws"] + p["bs"], LOG_STD_MIN, LOG_STD_MAX)
    return mean, log_std


def reference_forward_bf16(state, p):
    dt = jnp.bfloat16

    def mm(a, w):
        return jnp.dot(a.astype(dt), w.astype(dt),
                       preferred_element_type=jnp.float32)

    h1 = jnp.maximum(mm(state, p["w1"]) + p["b1"], 0.0)
    h2 = jnp.maximum(mm(h1, p["w2"]) + p["b2"], 0.0)
    mean = mm(h2, p["wm"]) + p["bm"]
    log_std = jnp.clip(mm(h2, p["ws"]) + p["bs"], LOG_STD_MIN, LOG_STD_MAX)
    return mean, log_std


if __name__ == "__main__":
    # Small shapes consistent with SafeActor(state_dim, action_dim, hidden_dim)
    batch, state_dim, action_dim, hidden_dim = 4, 16, 8, 32

    key = jax.random.PRNGKey(0)
    k_state, k_params = jax.random.split(key)
    state = jax.random.normal(k_state, (batch, state_dim), jnp.float32)
    params = init_params(k_params, state_dim, action_dim, hidden_dim)

    mean, log_std = safe_actor_forward(state, params)
    jax.block_until_ready((mean, log_std))

    assert mean.shape == (batch, action_dim)
    assert log_std.shape == (batch, action_dim)

    # Exact-ish check against a reference using the same bf16-input / f32-acc
    # matmul recipe as the kernel.
    mean_bf, log_std_bf = reference_forward_bf16(state, params)
    assert jnp.allclose(mean, mean_bf, atol=1e-2, rtol=1e-2)
    assert jnp.allclose(log_std, log_std_bf, atol=1e-2, rtol=1e-2)

    # Loose sanity check against the full-f32 reference of the PyTorch forward.
    mean_f32, log_std_f32 = reference_forward_f32(state, params)
    assert jnp.allclose(mean, mean_f32, atol=1e-1, rtol=1e-1)
    assert jnp.allclose(log_std, log_std_f32, atol=1e-1, rtol=1e-1)
    assert bool(jnp.all(log_std >= LOG_STD_MIN)) and bool(jnp.all(log_std <= LOG_STD_MAX))

    # TODO(synk): SafeActor.sample() (rsample + tanh-squash log-prob) is a
    # stochastic method outside forward(); not implemented in the kernel.

    print("KERNEL_OK")
</pallas_src>

<mosaic_0001>
module attributes {stable_mosaic.version = 11 : i64} {
  func.func @safe_actor_kernel(%arg0: i32, %arg1: memref<8x128xbf16, #tpu.memory_space<vmem>>, %arg2: memref<128x128xbf16, #tpu.memory_space<vmem>>, %arg3: memref<1x128xf32, #tpu.memory_space<vmem>>, %arg4: memref<128x128xbf16, #tpu.memory_space<vmem>>, %arg5: memref<1x128xf32, #tpu.memory_space<vmem>>, %arg6: memref<128x256xbf16, #tpu.memory_space<vmem>>, %arg7: memref<1x256xf32, #tpu.memory_space<vmem>>, %arg8: memref<8x128xf32, #tpu.memory_space<vmem>>, %arg9: memref<8x128xf32, #tpu.memory_space<vmem>>) attributes {dimension_semantics = [#tpu.dimension_semantics<parallel>], iteration_bounds = array<i64: 1>, scalar_prefetch = 0 : i64, scratch_operands = 0 : i64, tpu.core_type = #tpu.core_type<tc>, window_params = [{transform_indices = @transform_0, window_bounds = array<i64: 8, 128>}, {pipeline_mode = #tpu.pipeline_mode<synchronous>, transform_indices = @transform_1, window_bounds = array<i64: 128, 128>}, {pipeline_mode = #tpu.pipeline_mode<synchronous>, transform_indices = @transform_2, window_bounds = array<i64: 1, 128>}, {pipeline_mode = #tpu.pipeline_mode<synchronous>, transform_indices = @transform_3, window_bounds = array<i64: 128, 128>}, {pipeline_mode = #tpu.pipeline_mode<synchronous>, transform_indices = @transform_4, window_bounds = array<i64: 1, 128>}, {pipeline_mode = #tpu.pipeline_mode<synchronous>, transform_indices = @transform_5, window_bounds = array<i64: 128, 256>}, {pipeline_mode = #tpu.pipeline_mode<synchronous>, transform_indices = @transform_6, window_bounds = array<i64: 1, 256>}, {transform_indices = @transform_7, window_bounds = array<i64: 8, 128>}, {transform_indices = @transform_8, window_bounds = array<i64: 8, 128>}]} {
    %c0 = arith.constant 0 : index
    %c0_0 = arith.constant 0 : index
    %0 = vector.load %arg1[%c0, %c0_0] : memref<8x128xbf16, #tpu.memory_space<vmem>>, vector<8x128xbf16>
    %c0_1 = arith.constant 0 : index
    %c0_2 = arith.constant 0 : index
    %1 = vector.load %arg2[%c0_1, %c0_2] : memref<128x128xbf16, #tpu.memory_space<vmem>>, vector<128x128xbf16>
    %cst = arith.constant dense<0.000000e+00> : vector<8x128xf32>
    %2 = tpu.matmul %0, %1, %cst {dimension_numbers = #tpu.dot_dimension_numbers<[1], [0], [0], [1], [0, 0, 1, 1], [], []>} : vector<8x128xbf16>, vector<128x128xbf16>, vector<8x128xf32> -> vector<8x128xf32>
    %c0_3 = arith.constant 0 : index
    %c0_4 = arith.constant 0 : index
    %3 = vector.load %arg3[%c0_3, %c0_4] : memref<1x128xf32, #tpu.memory_space<vmem>>, vector<1x128xf32>
    %4 = vector.broadcast %3 : vector<1x128xf32> to vector<8x128xf32>
    %5 = arith.addf %2, %4 : vector<8x128xf32>
    %cst_5 = arith.constant 0.000000e+00 : f32
    %6 = vector.broadcast %cst_5 : f32 to vector<8x128xf32>
    %7 = arith.maximumf %5, %6 : vector<8x128xf32>
    %8 = arith.truncf %7 : vector<8x128xf32> to vector<8x128xbf16>
    %c0_6 = arith.constant 0 : index
    %c0_7 = arith.constant 0 : index
    %9 = vector.load %arg4[%c0_6, %c0_7] : memref<128x128xbf16, #tpu.memory_space<vmem>>, vector<128x128xbf16>
    %cst_8 = arith.constant dense<0.000000e+00> : vector<8x128xf32>
    %10 = tpu.matmul %8, %9, %cst_8 {dimension_numbers = #tpu.dot_dimension_numbers<[1], [0], [0], [1], [0, 0, 1, 1], [], []>} : vector<8x128xbf16>, vector<128x128xbf16>, vector<8x128xf32> -> vector<8x128xf32>
    %c0_9 = arith.constant 0 : index
    %c0_10 = arith.constant 0 : index
    %11 = vector.load %arg5[%c0_9, %c0_10] : memref<1x128xf32, #tpu.memory_space<vmem>>, vector<1x128xf32>
    %12 = vector.broadcast %11 : vector<1x128xf32> to vector<8x128xf32>
    %13 = arith.addf %10, %12 : vector<8x128xf32>
    %cst_11 = arith.constant 0.000000e+00 : f32
    %14 = vector.broadcast %cst_11 : f32 to vector<8x128xf32>
    %15 = arith.maximumf %13, %14 : vector<8x128xf32>
    %16 = arith.truncf %15 : vector<8x128xf32> to vector<8x128xbf16>
    %c0_12 = arith.constant 0 : index
    %c0_13 = arith.constant 0 : index
    %17 = vector.load %arg6[%c0_12, %c0_13] : memref<128x256xbf16, #tpu.memory_space<vmem>>, vector<128x256xbf16>
    %cst_14 = arith.constant dense<0.000000e+00> : vector<8x256xf32>
    %18 = tpu.matmul %16, %17, %cst_14 {dimension_numbers = #tpu.dot_dimension_numbers<[1], [0], [0], [1], [0, 0, 1, 1], [], []>} : vector<8x128xbf16>, vector<128x256xbf16>, vector<8x256xf32> -> vector<8x256xf32>
    %c0_15 = arith.constant 0 : index
    %c0_16 = arith.constant 0 : index
    %19 = vector.load %arg7[%c0_15, %c0_16] : memref<1x256xf32, #tpu.memory_space<vmem>>, vector<1x256xf32>
    %20 = vector.broadcast %19 : vector<1x256xf32> to vector<8x256xf32>
    %21 = arith.addf %18, %20 : vector<8x256xf32>
    %22 = vector.extract_strided_slice %21 {offsets = [0, 0], sizes = [8, 128], strides = [1, 1]} : vector<8x256xf32> to vector<8x128xf32>
    %c0_17 = arith.constant 0 : index
    %c0_18 = arith.constant 0 : index
    %23 = vector.load %arg8[%c0_17, %c0_18] : memref<8x128xf32, #tpu.memory_space<vmem>>, vector<8x128xf32>
    tpu.vector_store %arg8[%c0_17, %c0_18], %22 {strides = array<i32>} : memref<8x128xf32, #tpu.memory_space<vmem>>, vector<8x128xf32>,
    %24 = vector.extract_strided_slice %21 {offsets = [0, 128], sizes = [8, 128], strides = [1, 1]} : vector<8x256xf32> to vector<8x128xf32>
    %cst_19 = arith.constant -2.000000e+01 : f32
    %cst_20 = arith.constant 2.000000e+00 : f32
    %25 = vector.broadcast %cst_19 : f32 to vector<8x128xf32>
    %26 = arith.maximumf %25, %24 : vector<8x128xf32>
    %27 = vector.broadcast %cst_20 : f32 to vector<8x128xf32>
    %28 = arith.minimumf %27, %26 : vector<8x128xf32>
    %c0_21 = arith.constant 0 : index
    %c0_22 = arith.constant 0 : index
    %29 = vector.load %arg9[%c0_21, %c0_22] : memref<8x128xf32, #tpu.memory_space<vmem>>, vector<8x128xf32>
    tpu.vector_store %arg9[%c0_21, %c0_22], %28 {strides = array<i32>} : memref<8x128xf32, #tpu.memory_space<vmem>>, vector<8x128xf32>,
    return
  }
  func.func @transform_0(%arg0: i32) -> (i32, i32) {
    %c0_i32 = arith.constant 0 : i32
    %c0_i32_0 = arith.constant 0 : i32
    return %arg0, %c0_i32 : i32, i32
  }
  func.func @transform_1(%arg0: i32) -> (i32, i32) {
    %c0_i32 = arith.constant 0 : i32
    %c0_i32_0 = arith.constant 0 : i32
    %c0_i32_1 = arith.constant 0 : i32
    return %c0_i32, %c0_i32_0 : i32, i32
  }
  func.func @transform_2(%arg0: i32) -> (i32, i32) {
    %c0_i32 = arith.constant 0 : i32
    %c0_i32_0 = arith.constant 0 : i32
    %c0_i32_1 = arith.constant 0 : i32
    return %c0_i32, %c0_i32_0 : i32, i32
  }
  func.func @transform_3(%arg0: i32) -> (i32, i32) {
    %c0_i32 = arith.constant 0 : i32
    %c0_i32_0 = arith.constant 0 : i32
    %c0_i32_1 = arith.constant 0 : i32
    return %c0_i32, %c0_i32_0 : i32, i32
  }
  func.func @transform_4(%arg0: i32) -> (i32, i32) {
    %c0_i32 = arith.constant 0 : i32
    %c0_i32_0 = arith.constant 0 : i32
    %c0_i32_1 = arith.constant 0 : i32
    return %c0_i32, %c0_i32_0 : i32, i32
  }
  func.func @transform_5(%arg0: i32) -> (i32, i32) {
    %c0_i32 = arith.constant 0 : i32
    %c0_i32_0 = arith.constant 0 : i32
    %c0_i32_1 = arith.constant 0 : i32
    return %c0_i32, %c0_i32_0 : i32, i32
  }
  func.func @transform_6(%arg0: i32) -> (i32, i32) {
    %c0_i32 = arith.constant 0 : i32
    %c0_i32_0 = arith.constant 0 : i32
    %c0_i32_1 = arith.constant 0 : i32
    return %c0_i32, %c0_i32_0 : i32, i32
  }
  func.func @transform_7(%arg0: i32) -> (i32, i32) {
    %c0_i32 = arith.constant 0 : i32
    %c0_i32_0 = arith.constant 0 : i32
    return %arg0, %c0_i32 : i32, i32
  }
  func.func @transform_8(%arg0: i32) -> (i32, i32) {
    %c0_i32 = arith.constant 0 : i32
    %c0_i32_0 = arith.constant 0 : i32
    return %arg0, %c0_i32 : i32, i32
  }
}

</mosaic_0001>

<bundles_post_ra>
// kernel: tpu_custom_call.1
= control target key start
LH: loop header
LB: loop body
LE: loop exit
PB: predicated region body
PF: predicated region fallthrough
CT: control target
= control target key end

     0   :  { %14 = vsyncpa [#allocation3], 0  ;;  %s927_s0 = inlined_call_operand.hbm [shape: bf16[8,128], index: 0, kind: input, shape index: {}]   ;;  %s928_s1 = inlined_call_operand.hbm [shape: bf16[128,128], index: 1, kind: input, shape index: {}]   ;;  %s929_s2 = inlined_call_operand.vmem [shape: f32[1,128], index: 2, kind: input, shape index: {}]   ;;  %s930_s3 = inlined_call_operand.hbm [shape: bf16[128,128], index: 3, kind: input, shape index: {}]   ;;  %s931_s4 = inlined_call_operand.vmem [shape: f32[1,128], index: 4, kind: input, shape index: {}]   ;;  %s932_s5 = inlined_call_operand.hbm [shape: bf16[128,256], index: 5, kind: input, shape index: {}]   ;;  %s933_s6 = inlined_call_operand.vmem [shape: f32[1,256], index: 6, kind: input, shape index: {}]   ;;  %s934_s7 = inlined_call_operand.hbm [shape: f32[8,128], index: 7, kind: output, shape index: {0}]   ;;  %s935_s8 = inlined_call_operand.hbm [shape: f32[8,128], index: 8, kind: output, shape index: {1}]  }
   0x1   :  { %15 = vsyncpa [#allocation6], 0 }
   0x2   :  { %16 = vsyncpa [#allocation9], 0 }
   0x3   :  { %17 = vsyncpa [#allocation4], 0 }
   0x4   :  { %18 = vsyncpa [#allocation12], 0  ;;  %s782_s27 = smov [#allocation5]   ;;  %s640_s9 = scalar_lea.hbm %s928_s1, 1024 }
   0x5   :  { %s34_s28 = sshll.u32 %s782_s27, 4  ;;  %p641_p0 = scmp.ne.s32.totalorder %s928_s1, %s640_s9  ;;  %s35_s28 = int_to_ptr.vmem [resolvable:$true] %s34_s28 }
   0x6   :  { %p644_p1 = scmp.lt.u32.totalorder %s640_s9, %s928_s1 }
   0x8   :  { %p646_p2 = pnand %p644_p1, %p641_p0 }
   0xa   :  { %649 = shalt.err (!%p646_p2)
}
   0xb   :  { %s650_s14 = scalar_lea.vmem %s35_s28, 1024  ;;  %p655_p4 = scmp.lt.s32.totalorder %s35_s28, %s35_s28 }
   0xc   :  { %p651_p3 = scmp.ne.s32.totalorder %s35_s28, %s650_s14  ;;  %p656_p5 = scmp.lt.s32.totalorder %s650_s14, %s650_s14 }
   0xe   :  { %p657_p6 = por %p656_p5, %p655_p4 }
  0x10   :  { %p658_p7 = pnand %p657_p6, %p651_p3 }
  0x12   :  { %661 = shalt.err (!%p658_p7)
}
  0x13   :  { %s783_s15 = smov 64   ;;  %s784_s16 = smov 4  }
  0x14   :  { %40 = dma.hbm_to_vmem [thread:$0]  %s928_s1, 1024, %s35_s28, [#allocation6], %s783_s15, %s783_s15, %s784_s16  }
  0x15   :  { %s785_s19 = smov [#allocation2]   ;;  %s786_s21 = smov [#allocation7]  }
  0x16   :  { %s25_s20 = sshll.u32 %s785_s19, 4  ;;  %s48_s22 = sshll.u32 %s786_s21, 4  ;;  %s26_s20 = int_to_ptr.vmem [resolvable:$true] %s25_s20  ;;  %s49_s22 = int_to_ptr.vmem [resolvable:$true] %s48_s22 }
  0x17   :  { %s662_s25 = scalar_lea.hbm %s927_s0, 64 }
  0x18   :  { %p663_p8 = scmp.ne.s32.totalorder %s927_s0, %s662_s25  ;;  %p666_p9 = scmp.lt.u32.totalorder %s662_s25, %s927_s0 }
  0x1a   :  { %p668_p10 = pnand %p666_p9, %p663_p8 }
  0x1c   :  { %671 = shalt.err (!%p668_p10)
}
  0x1d   :  { %s672_s1 = scalar_lea.vmem %s26_s20, 64  ;;  %p677_p12 = scmp.lt.s32.totalorder %s26_s20, %s26_s20 }
  0x1e   :  { %p673_p11 = scmp.ne.s32.totalorder %s26_s20, %s672_s1  ;;  %p678_p13 = scmp.lt.s32.totalorder %s672_s1, %s672_s1 }
  0x20   :  { %p679_p0 = por %p678_p13, %p677_p12 }
  0x22   :  { %p680_p1 = pnand %p679_p0, %p673_p11 }
  0x24   :  { %683 = shalt.err (!%p680_p1)
}
  0x25   :  { %28 = dma.hbm_to_vmem [thread:$0]  %s927_s0, 64, %s26_s20, [#allocation3]  }
  0x26   :  { %s684_s12 = scalar_lea.hbm %s930_s3, 1024 }
  0x27   :  { %p685_p2 = scmp.ne.s32.totalorder %s930_s3, %s684_s12  ;;  %p688_p3 = scmp.lt.u32.totalorder %s684_s12, %s930_s3 }
  0x29   :  { %p690_p4 = pnand %p688_p3, %p685_p2 }
  0x2b   :  { %693 = shalt.err (!%p690_p4)
}
  0x2c   :  { %s694_s19 = scalar_lea.vmem %s49_s22, 1024  ;;  %p699_p6 = scmp.lt.s32.totalorder %s49_s22, %s49_s22 }
  0x2d   :  { %p695_p5 = scmp.ne.s32.totalorder %s49_s22, %s694_s19  ;;  %p700_p7 = scmp.lt.s32.totalorder %s694_s19, %s694_s19 }
  0x2f   :  { %p701_p8 = por %p700_p7, %p699_p6 }
  0x31   :  { %p702_p9 = pnand %p701_p8, %p695_p5 }
  0x33   :  { %705 = shalt.err (!%p702_p9)
}
  0x34   :  { %54 = dma.hbm_to_vmem [thread:$0]  %s930_s3, 1024, %s49_s22, [#allocation6], %s783_s15, %s783_s15, %s784_s16  }
  0x35   :  { %s787_s21 = smov [#allocation8]   ;;  %s706_s26 = scalar_lea.hbm %s932_s5, 2048 }
  0x36   :  { %s62_s23 = sshll.u32 %s787_s21, 4  ;;  %p707_p10 = scmp.ne.s32.totalorder %s932_s5, %s706_s26  ;;  %s63_s23 = int_to_ptr.vmem [resolvable:$true] %s62_s23 }
  0x37   :  { %p710_p11 = scmp.lt.u32.totalorder %s706_s26, %s932_s5 }
  0x39   :  { %p712_p12 = pnand %p710_p11, %p707_p10 }
  0x3b   :  { %715 = shalt.err (!%p712_p12)
}
  0x3c   :  { %s716_s28 = scalar_lea.vmem %s63_s23, 2048  ;;  %p721_p0 = scmp.lt.s32.totalorder %s63_s23, %s63_s23 }
  0x3d   :  { %p717_p13 = scmp.ne.s32.totalorder %s63_s23, %s716_s28  ;;  %p722_p1 = scmp.lt.s32.totalorder %s716_s28, %s716_s28 }
  0x3f   :  { %p723_p2 = por %p722_p1, %p721_p0 }
  0x41   :  { %p724_p3 = pnand %p723_p2, %p717_p13 }
  0x43   :  { %727 = shalt.err (!%p724_p3)
}
  0x44   :  { %s788_s3 = smov 128   ;;  %s789_s15 = smov 8  }
  0x45   :  { %68 = dma.hbm_to_vmem [thread:$0]  %s932_s5, 2048, %s63_s23, [#allocation9], %s788_s3, %s788_s3, %s789_s15  }
  0x46   :  { %772 = dma.done.wait [#allocation3], 64  }
  0x47   :  { %773 = vsyncadd [#allocation3], 4294967232 }
  0x48   :  { %774 = dma.done.wait [#allocation6], 2048  }
  0x49   :  { %775 = vsyncadd [#allocation6], 4294965248 }
  0x4a   :  { %776 = dma.done.wait [#allocation9], 2048  }
  0x4b   :  { %777 = vsyncadd [#allocation9], 4294965248  ;;  %v790_v0 = vmov 0.0   ;;  %vm791_vm0 = vmmov 0   ;;  %v600_v1 = vld [vmem:[#allocation5] sm:$0xff]   ;;  %v601_v2 = vld [vmem:[#allocation5 + $0x8] sm:$0xff]   ;;  %v329_v51 = vlaneseq }
  0x4c   :  { %547 = vmatprep.subr.bf16.mxu0 %v790_v0  ;;  %563 = vmatprep.mubr.msk.bf16.mxu0 %vm791_vm0, %v790_v0  ;;  %v602_v3 = vld [vmem:[#allocation5 + $0x10] sm:$0xff]   ;;  %v608_v4 = vld [vmem:[#allocation7] sm:$0xff]   ;;  %v603_v5 = vld [vmem:[#allocation5 + $0x18] sm:$0xff]   ;;  %v792_v42 = vmov 0   ;;  %s793_s13 = smov [#allocation10]   ;;  %s794_s14 = smov [#allocation11]  }
  0x4d   :  { %567 = vmatprep.subr.bf16.mxu1 %v790_v0  ;;  %583 = vmatprep.mubr.msk.bf16.mxu1 %vm791_vm0, %v790_v0  ;;  %v609_v6 = vld [vmem:[#allocation7 + $0x8] sm:$0xff]   ;;  %v604_v7 = vld [vmem:[#allocation5 + $0x20] sm:$0xff]   ;;  %v610_v8 = vld [vmem:[#allocation7 + $0x10] sm:$0xff]   ;;  %v330_v52 = vshrl.u32 %v329_v51, 7  ;;  %s480_s17 = sshll.u32 %s794_s14, 4  ;;  %s481_s17 = int_to_ptr.vmem [resolvable:$true] %s480_s17 }
  0x4e   :  { %548 = vmatpush3.bf16.msra.mxu0 %v600_v1  ;;  %568 = vmatpush3.bf16.msra.mxu1 %v608_v4  ;;  %v605_v9 = vld [vmem:[#allocation5 + $0x28] sm:$0xff]   ;;  %v611_v10 = vld [vmem:[#allocation7 + $0x18] sm:$0xff]   ;;  %v606_v11 = vld [vmem:[#allocation5 + $0x30] sm:$0xff]  }
  0x4f   :  { %549 = vmatprep.subr.bf16.mxu0 %v790_v0  ;;  %569 = vmatprep.subr.bf16.mxu1 %v790_v0  ;;  %v612_v12 = vld [vmem:[#allocation7 + $0x20] sm:$0xff]   ;;  %v607_v13 = vld [vmem:[#allocation5 + $0x38] sm:$0xff]   ;;  %v613_v14 = vld [vmem:[#allocation7 + $0x28] sm:$0xff]   ;;  %v331_v53 = vsub.s32 0, %v330_v52  ;;  %v335_v55 = vsub.s32 1, %v330_v52 }
  0x50   :  { %v84_v15 = vld [vmem:[#allocation2] sm:$0xf]  ;;  %v614_v16 = vld [vmem:[#allocation7 + $0x30] sm:$0xff]   ;;  %v616_v18 = vld [vmem:[#allocation8] ss:$8 sps:$4 sm:$0xff]  }
  0x51   :  { %v615_v17 = vld [vmem:[#allocation7 + $0x38] sm:$0xff]   ;;  %v618_v19 = vld [vmem:[#allocation8 + $0x4] ss:$8 sps:$4 sm:$0xff]   ;;  %v622_v23 = vld [vmem:[#allocation8 + $0x20] ss:$8 sps:$4 sm:$0xff]  }
  0x52   :  { %550 = vmatpush3.bf16.msra.mxu0 %v601_v2  ;;  %570 = vmatpush3.bf16.msra.mxu1 %v609_v6  ;;  %v621_v20 = vld [vmem:[#allocation8 + $0x14] ss:$8 sps:$4 sm:$0xff]   ;;  %v619_v21 = vld [vmem:[#allocation8 + $0x10] ss:$8 sps:$4 sm:$0xff]   ;;  %v624_v22 = vld [vmem:[#allocation8 + $0x24] ss:$8 sps:$4 sm:$0xff]  }
  0x53   :  { %551 = vmatprep.subr.bf16.mxu0 %v790_v0  ;;  %571 = vmatprep.subr.bf16.mxu1 %v790_v0  ;;  %v627_v24 = vld [vmem:[#allocation8 + $0x34] ss:$8 sps:$4 sm:$0xff]   ;;  %v625_v25 = vld [vmem:[#allocation8 + $0x30] ss:$8 sps:$4 sm:$0xff]   ;;  %v630_v26 = vld [vmem:[#allocation8 + $0x44] ss:$8 sps:$4 sm:$0xff]  }
  0x54   :  { %v628_v27 = vld [vmem:[#allocation8 + $0x40] ss:$8 sps:$4 sm:$0xff]   ;;  %v633_v28 = vld [vmem:[#allocation8 + $0x54] ss:$8 sps:$4 sm:$0xff]   ;;  %v631_v29 = vld [vmem:[#allocation8 + $0x50] ss:$8 sps:$4 sm:$0xff]  }
  0x55   :  { %v636_v30 = vld [vmem:[#allocation8 + $0x64] ss:$8 sps:$4 sm:$0xff]   ;;  %v634_v31 = vld [vmem:[#allocation8 + $0x60] ss:$8 sps:$4 sm:$0xff]   ;;  %v495_v32 = vld [vmem:[%s929_s2] ss:$0 sm:$0xff] }
  0x56   :  { %552 = vmatpush3.bf16.msra.mxu0 %v602_v3  ;;  %572 = vmatpush3.bf16.msra.mxu1 %v610_v8  ;;  %v639_v40 = vld [vmem:[#allocation8 + $0x74] ss:$8 sps:$4 sm:$0xff]   ;;  %v637_v41 = vld [vmem:[#allocation8 + $0x70] ss:$8 sps:$4 sm:$0xff]  }
  0x57   :  { %553 = vmatprep.subr.bf16.mxu0 %v790_v0  ;;  %573 = vmatprep.subr.bf16.mxu1 %v790_v0  ;;  %v504_v43 = vld [vmem:[%s931_s4] ss:$0 sm:$0xff]  ;;  %s470_s4 = sshll.u32 %s793_s13, 4  ;;  %s471_s4 = int_to_ptr.vmem [resolvable:$true] %s470_s4 }
  0x58   :  { %v327_v54 = vld [vmem:[%s933_s6] sm:$0x3]  ;;  %s728_s18 = scalar_lea.vmem %s471_s4, 128  ;;  %p733_p5 = scmp.lt.s32.totalorder %s471_s4, %s471_s4 }
  0x59   :  { %v332_v56 = vrot.slane %v327_v54, %v331_v53  ;;  %v336_v57 = vrot.slane %v327_v54, %v335_v55  ;;  %p729_p4 = scmp.ne.s32.totalorder %s471_s4, %s728_s18  ;;  %p734_p6 = scmp.lt.s32.totalorder %s728_s18, %s728_s18 }
  0x5a   :  { %554 = vmatpush3.bf16.msra.mxu0 %v603_v5  ;;  %574 = vmatpush3.bf16.msra.mxu1 %v611_v10 }
  0x5b   :  { %555 = vmatprep.subr.bf16.mxu0 %v790_v0  ;;  %575 = vmatprep.subr.bf16.mxu1 %v790_v0  ;;  %p735_p7 = por %p734_p6, %p733_p5 }
  0x5d   :  { %p736_p8 = pnand %p735_p7, %p729_p4 }
  0x5e   :  { %556 = vmatpush3.bf16.msra.mxu0 %v604_v7  ;;  %576 = vmatpush3.bf16.msra.mxu1 %v612_v12 }
  0x5f   :  { %557 = vmatprep.subr.bf16.mxu0 %v790_v0  ;;  %577 = vmatprep.subr.bf16.mxu1 %v790_v0 }
  0x62   :  { %558 = vmatpush3.bf16.msra.mxu0 %v605_v9  ;;  %578 = vmatpush3.bf16.msra.mxu1 %v613_v14 }
  0x63   :  { %559 = vmatprep.subr.bf16.mxu0 %v790_v0  ;;  %579 = vmatprep.subr.bf16.mxu1 %v790_v0 }
  0x66   :  { %560 = vmatpush3.bf16.msra.mxu0 %v606_v11  ;;  %580 = vmatpush3.bf16.msra.mxu1 %v614_v16 }
  0x67   :  { %561 = vmatprep.subr.bf16.mxu0 %v790_v0  ;;  %581 = vmatprep.subr.bf16.mxu1 %v790_v0 }
  0x6a   :  { %562 = vmatpush3.bf16.msra.mxu0 %v607_v13  ;;  %582 = vmatpush3.bf16.msra.mxu1 %v615_v17 }
  0x6b   :  { %419 = vmatprep.subr.bf16.mxu0 %v618_v19 }
  0x6d   :  { %564 = vmatmul.mubr.bf16.vlgmr.msra.gmra.mrb[0].mxu0 %v84_v15 }
  0x6e   :  { %420 = vmatpush1.bf16.msra.mxu0 %v616_v18  ;;  %451 = vmatprep.mubr.bf16.mxu0 %v792_v42 }
  0x6f   :  { %421 = vmatprep.subr.bf16.mxu0 %v621_v20 }
  0x72   :  { %422 = vmatpush1.bf16.msra.mxu0 %v619_v21 }
  0x73   :  { %423 = vmatprep.subr.bf16.mxu0 %v624_v22 }
  0x76   :  { %424 = vmatpush1.bf16.msra.mxu0 %v622_v23 }
  0x77   :  { %425 = vmatprep.subr.bf16.mxu0 %v627_v24 }
  0x7a   :  { %426 = vmatpush1.bf16.msra.mxu0 %v625_v25 }
  0x7b   :  { %427 = vmatprep.subr.bf16.mxu0 %v630_v26 }
  0x7e   :  { %428 = vmatpush1.bf16.msra.mxu0 %v628_v27 }
  0x7f   :  { %429 = vmatprep.subr.bf16.mxu0 %v633_v28 }
  0x82   :  { %430 = vmatpush1.bf16.msra.mxu0 %v631_v29 }
  0x83   :  { %431 = vmatprep.subr.bf16.mxu0 %v636_v30 }
  0x86   :  { %432 = vmatpush1.bf16.msra.mxu0 %v634_v31 }
  0x87   :  { %433 = vmatprep.subr.bf16.mxu0 %v639_v40 }
  0x8a   :  { %434 = vmatpush1.bf16.msra.mxu0 %v637_v41 }
 0x140   :  { %v190_v33 = vpop.f32.mrb[0].mxu0 }
 0x141   :  { %v191_v34 = vadd.f32 %v495_v32, %v190_v33  ;;  %v565_v35 = vpop.f32.mrb[1].mxu0 }
 0x142   :  { %v193_v36 = vpop.f32.mrb[2].mxu0 }
 0x143   :  { %v196_v37 = vmax.f32 %v191_v34, 0.0  ;;  %v566_v38 = vpop.f32.mrb[3].mxu0 }
 0x145   :  { %v197_v39 = vpack.c.bf16 %v196_v37, %v196_v37 }
 0x147   :  { %584 = vmatmul.mubr.bf16.vlgmr.msra.gmra.mrb[0].mxu1 %v197_v39 }
 0x21a   :  { %v303_v44 = vpop.f32.mrb[0].mxu1 }
 0x21b   :  { %v304_v45 = vadd.f32 %v504_v43, %v303_v44  ;;  %v585_v46 = vpop.f32.mrb[1].mxu1 }
 0x21c   :  { %v306_v47 = vpop.f32.mrb[2].mxu1 }
 0x21d   :  { %v309_v48 = vmax.f32 %v304_v45, 0.0  ;;  %v586_v49 = vpop.f32.mrb[3].mxu1 }
 0x21f   :  { %v310_v50 = vpack.c.bf16 %v309_v48, %v309_v48 }
 0x221   :  { %452 = vmatmul.mubr.bf16.vlgmr.msra.gmra.mrb[4].mxu0 %v310_v50 }
 0x2f4   :  { %v453_v58 = vpop.f32.mrb[4].mxu0 }
 0x2f5   :  { %v454_v59 = vadd.f32 %v453_v58, %v332_v56  ;;  %v455_v60 = vpop.f32.mrb[5].mxu0 }
 0x2f6   :  { %v456_v61 = vadd.f32 %v455_v60, %v336_v57  ;;  %v457_v62 = vpop.f32.mrb[6].mxu0 }
 0x2f7   :  { %460 = vst [vmem:[#allocation10] sm:$0xff] %v454_v59  ;;  %v458_v63 = vpop.f32.mrb[7].mxu0 }
 0x2f8   :  { %v461_v0 = vmax.f32 %v456_v61, -20.0 }
 0x2f9   :  { %739 = shalt.err (!%p736_p8)
}
 0x2fa   :  { %s740_s0 = scalar_lea.hbm %s934_s7, 128 }
 0x2fb   :  { %p741_p9 = scmp.ne.s32.totalorder %s934_s7, %s740_s0  ;;  %p744_p10 = scmp.lt.u32.totalorder %s740_s0, %s934_s7 }
 0x2fd   :  { %p746_p11 = pnand %p744_p10, %p741_p9 }
 0x2ff   :  { %749 = shalt.err (!%p746_p11)
}
 0x300   :  { %473 = dma.vmem_to_hbm [thread:$0]  %s471_s4, 128, %s934_s7, [#allocation4]   ;;  %v462_v1 = vmin.f32 %v461_v0, 2.0 }
 0x301   :  { %s750_s27 = scalar_lea.vmem %s481_s17, 128  ;;  %p755_p13 = scmp.lt.s32.totalorder %s481_s17, %s481_s17 }
 0x302   :  { %463 = vst [vmem:[#allocation11] sm:$0xff] %v462_v1  ;;  %p751_p12 = scmp.ne.s32.totalorder %s481_s17, %s750_s27  ;;  %p756_p0 = scmp.lt.s32.totalorder %s750_s27, %s750_s27 }
 0x304   :  { %p757_p1 = por %p756_p0, %p755_p13 }
 0x306   :  { %p758_p2 = pnand %p757_p1, %p751_p12 }
 0x308   :  { %761 = shalt.err (!%p758_p2)
}
 0x309   :  { %s762_s1 = scalar_lea.hbm %s935_s8, 128 }
 0x30a   :  { %p763_p3 = scmp.ne.s32.totalorder %s935_s8, %s762_s1  ;;  %p766_p4 = scmp.lt.u32.totalorder %s762_s1, %s935_s8 }
 0x30c   :  { %p768_p5 = pnand %p766_p4, %p763_p3 }
 0x30e   :  { %771 = shalt.err (!%p768_p5)
}
 0x30f   :  { %483 = dma.vmem_to_hbm [thread:$0]  %s481_s17, 128, %s935_s8, [#allocation12]  }
 0x310   :  { %778 = dma.done.wait [#allocation4], 128  }
 0x311   :  { %779 = vsyncadd [#allocation4], 4294967168 }
 0x312   :  { %780 = dma.done.wait [#allocation12], 128  }
 0x313   :  { %781 = vsyncadd [#allocation12], 4294967168 }
 0x314   :  { %490 = vsyncpa [#allocation3], 1 }
 0x315   :  { %491 = vsyncpa [#allocation6], 1 }
 0x316   :  { %492 = vsyncpa [#allocation9], 1 }
 0x317   :  { %493 = vsyncpa [#allocation4], 1 }
 0x318   :  { %494 = vsyncpa [#allocation12], 1 }

</bundles_post_ra>
